<compile_context>
chip_gen: v7x
topology: tpu7x:2x2x1
jax: 0.10.0
libtpu: 0.0.40
codegen_flags: <defaults>
</compile_context>

<pallas_src>
import jax
import jax.numpy as jnp
from jax.experimental import pallas as pl
from jax.experimental.pallas import tpu as pltpu

IN_F = 28 * 28          # 784
IN_PAD = 896            # 7 * 128 (lane-dense K)
H1 = 128
H2 = 64
H2_PAD = 128
NCLS = 10
OUT_PAD = 128
TILE_B = 512            # per-tile VMEM: x 512x896 bf16 (~0.9 MiB) + out 512x128 f32


def _round_up(n, m):
    return (n + m - 1) // m * m


def mlp_kernel(x_ref, w1_ref, b1_ref, w2_ref, b2_ref, w3_ref, b3_ref, out_ref):
    # fc1 + relu  (bf16 MXU inputs, f32 accumulate)
    h1 = jnp.dot(x_ref[...], w1_ref[...], preferred_element_type=jnp.float32)
    h1 = jnp.maximum(h1 + b1_ref[...], 0.0)

    # fc2 + relu  (output lane-padded 64 -> 128; padded cols stay exactly 0)
    h2 = jnp.dot(h1.astype(jnp.bfloat16), w2_ref[...],
                 preferred_element_type=jnp.float32)
    h2 = jnp.maximum(h2 + b2_ref[...], 0.0)

    # fc3 (logits lane-padded 10 -> 128)
    logits = jnp.dot(h2.astype(jnp.bfloat16), w3_ref[...],
                     preferred_element_type=jnp.float32) + b3_ref[...]

    # Mask padded class columns to -inf so they drop out of the softmax
    # normalization, then numerically-stable log_softmax over the last axis.
    col = jax.lax.broadcasted_iota(jnp.int32, logits.shape, dimension=1)
    logits = jnp.where(col < NCLS, logits, -jnp.inf)
    m = jnp.max(logits, axis=-1, keepdims=True)
    shifted = logits - m
    lse = jnp.log(jnp.sum(jnp.exp(shifted), axis=-1, keepdims=True))
    out_ref[...] = shifted - lse


@jax.jit
def net_forward(x, params):
    """x: [B, 1, 28, 28] (or anything flattening to [-1, 784]).

    Returns log-probabilities of shape [B, 10] (float32).
    `params` must come from prepare_params() (padded, bf16 weights).
    """
    w1, b1, w2, b2, w3, b3 = params
    x2d = x.reshape(-1, IN_F)
    B = x2d.shape[0]

    # Pick a tile size and pad the batch so every tile is full and the
    # (8, 128) block rule holds on the second-to-last dim.
    if B <= TILE_B:
        tile_b = _round_up(B, 8)
        b_pad = tile_b
    else:
        tile_b = TILE_B
        b_pad = _round_up(B, TILE_B)

    # Data prep fused under jit: cast to bf16 (halves kernel DMA; the MXU
    # would consume bf16 anyway) and zero-pad K (784 -> 896) plus the batch.
    x2d = jnp.pad(x2d.astype(jnp.bfloat16),
                  ((0, b_pad - B), (0, IN_PAD - IN_F)))

    grid = (b_pad // tile_b,)

    def const_spec(shape):
        return pl.BlockSpec(shape, lambda i: (0,) * len(shape))

    out = pl.pallas_call(
        mlp_kernel,
        out_shape=jax.ShapeDtypeStruct((b_pad, OUT_PAD), jnp.float32),
        grid=grid,
        in_specs=[
            pl.BlockSpec((tile_b, IN_PAD), lambda i: (i, 0)),   # x tile (streamed)
            const_spec((IN_PAD, H1)),                           # w1 (resident)
            const_spec((1, H1)),                                # b1
            const_spec((H1, H2_PAD)),                           # w2
            const_spec((1, H2_PAD)),                            # b2
            const_spec((H2_PAD, OUT_PAD)),                      # w3
            const_spec((1, OUT_PAD)),                           # b3
        ],
        out_specs=pl.BlockSpec((tile_b, OUT_PAD), lambda i: (i, 0)),
        compiler_params=pltpu.CompilerParams(
            dimension_semantics=("parallel",),
        ),
    )(x2d, w1, b1, w2, b2, w3, b3)

    return out[:B, :NCLS]


def init_params(key):
    """Deterministic init matching nn.Linear shapes, stored as (in, out), f32."""
    ks = jax.random.split(key, 6)

    def linear(kw, kb, fan_in, fan_out):
        bound = 1.0 / jnp.sqrt(fan_in)
        w = jax.random.uniform(kw, (fan_in, fan_out), jnp.float32, -bound, bound)
        b = jax.random.uniform(kb, (1, fan_out), jnp.float32, -bound, bound)
        return w, b

    w1, b1 = linear(ks[0], ks[1], IN_F, H1)
    w2, b2 = linear(ks[2], ks[3], H1, H2)
    w3, b3 = linear(ks[4], ks[5], H2, NCLS)
    return (w1, b1, w2, b2, w3, b3)


def prepare_params(params):
    """One-time: zero-pad to lane-dense shapes and cast weights to bf16."""
    w1, b1, w2, b2, w3, b3 = params
    w1p = jnp.pad(w1, ((0, IN_PAD - IN_F), (0, 0))).astype(jnp.bfloat16)
    b1p = b1.astype(jnp.float32)                                      # (1, 128)
    w2p = jnp.pad(w2, ((0, 0), (0, H2_PAD - H2))).astype(jnp.bfloat16)
    b2p = jnp.pad(b2, ((0, 0), (0, H2_PAD - H2))).astype(jnp.float32)
    w3p = jnp.pad(w3, ((0, H2_PAD - H2), (0, OUT_PAD - NCLS))).astype(jnp.bfloat16)
    b3p = jnp.pad(b3, ((0, 0), (0, OUT_PAD - NCLS))).astype(jnp.float32)
    return (w1p, b1p, w2p, b2p, w3p, b3p)


def reference_forward(x, params):
    """Pure-JAX f32 reference (unpadded), for correctness checking."""
    w1, b1, w2, b2, w3, b3 = params
    x2d = x.reshape(-1, IN_F).astype(jnp.float32)
    h1 = jnp.maximum(x2d @ w1 + b1, 0.0)
    h2 = jnp.maximum(h1 @ w2 + b2, 0.0)
    logits = h2 @ w3 + b3
    return jax.nn.log_softmax(logits, axis=-1)


if __name__ == "__main__":
    key = jax.random.PRNGKey(0)
    kparams, kx = jax.random.split(key)
    params_f32 = init_params(kparams)
    params = prepare_params(params_f32)

    # small batch of MNIST-shaped inputs
    x = jax.random.normal(kx, (8, 1, 28, 28), jnp.float32)

    out = net_forward(x, params)
    out = jax.block_until_ready(out)

    assert out.shape == (8, 10)
    # log_softmax rows should sum (in prob space) to ~1
    row_sums = jnp.sum(jnp.exp(out), axis=-1)
    assert bool(jnp.all(jnp.abs(row_sums - 1.0) < 1e-4))
    # match the f32 reference (loose tolerance: bf16 MXU inputs)
    ref = reference_forward(x, params_f32)
    assert bool(jnp.max(jnp.abs(out - ref)) < 5e-2)

    print("KERNEL_OK")
</pallas_src>

<mosaic_0001>
module attributes {stable_mosaic.version = 11 : i64} {
  func.func @mlp_kernel(%arg0: i32, %arg1: memref<8x896xbf16, #tpu.memory_space<vmem>>, %arg2: memref<896x128xbf16, #tpu.memory_space<vmem>>, %arg3: memref<1x128xf32, #tpu.memory_space<vmem>>, %arg4: memref<128x128xbf16, #tpu.memory_space<vmem>>, %arg5: memref<1x128xf32, #tpu.memory_space<vmem>>, %arg6: memref<128x128xbf16, #tpu.memory_space<vmem>>, %arg7: memref<1x128xf32, #tpu.memory_space<vmem>>, %arg8: memref<8x128xf32, #tpu.memory_space<vmem>>) attributes {dimension_semantics = [#tpu.dimension_semantics<parallel>], iteration_bounds = array<i64: 1>, scalar_prefetch = 0 : i64, scratch_operands = 0 : i64, tpu.core_type = #tpu.core_type<tc>, window_params = [{transform_indices = @transform_0, window_bounds = array<i64: 8, 896>}, {pipeline_mode = #tpu.pipeline_mode<synchronous>, transform_indices = @transform_1, window_bounds = array<i64: 896, 128>}, {pipeline_mode = #tpu.pipeline_mode<synchronous>, transform_indices = @transform_2, window_bounds = array<i64: 1, 128>}, {pipeline_mode = #tpu.pipeline_mode<synchronous>, transform_indices = @transform_3, window_bounds = array<i64: 128, 128>}, {pipeline_mode = #tpu.pipeline_mode<synchronous>, transform_indices = @transform_4, window_bounds = array<i64: 1, 128>}, {pipeline_mode = #tpu.pipeline_mode<synchronous>, transform_indices = @transform_5, window_bounds = array<i64: 128, 128>}, {pipeline_mode = #tpu.pipeline_mode<synchronous>, transform_indices = @transform_6, window_bounds = array<i64: 1, 128>}, {transform_indices = @transform_7, window_bounds = array<i64: 8, 128>}]} {
    %c0 = arith.constant 0 : index
    %c0_0 = arith.constant 0 : index
    %0 = vector.load %arg1[%c0, %c0_0] : memref<8x896xbf16, #tpu.memory_space<vmem>>, vector<8x896xbf16>
    %c0_1 = arith.constant 0 : index
    %c0_2 = arith.constant 0 : index
    %1 = vector.load %arg2[%c0_1, %c0_2] : memref<896x128xbf16, #tpu.memory_space<vmem>>, vector<896x128xbf16>
    %cst = arith.constant dense<0.000000e+00> : vector<8x128xf32>
    %2 = tpu.matmul %0, %1, %cst {dimension_numbers = #tpu.dot_dimension_numbers<[1], [0], [0], [1], [0, 0, 1, 1], [], []>} : vector<8x896xbf16>, vector<896x128xbf16>, vector<8x128xf32> -> vector<8x128xf32>
    %c0_3 = arith.constant 0 : index
    %c0_4 = arith.constant 0 : index
    %3 = vector.load %arg3[%c0_3, %c0_4] : memref<1x128xf32, #tpu.memory_space<vmem>>, vector<1x128xf32>
    %4 = vector.broadcast %3 : vector<1x128xf32> to vector<8x128xf32>
    %5 = arith.addf %2, %4 : vector<8x128xf32>
    %cst_5 = arith.constant 0.000000e+00 : f32
    %6 = vector.broadcast %cst_5 : f32 to vector<8x128xf32>
    %7 = arith.maximumf %5, %6 : vector<8x128xf32>
    %8 = arith.truncf %7 : vector<8x128xf32> to vector<8x128xbf16>
    %c0_6 = arith.constant 0 : index
    %c0_7 = arith.constant 0 : index
    %9 = vector.load %arg4[%c0_6, %c0_7] : memref<128x128xbf16, #tpu.memory_space<vmem>>, vector<128x128xbf16>
    %cst_8 = arith.constant dense<0.000000e+00> : vector<8x128xf32>
    %10 = tpu.matmul %8, %9, %cst_8 {dimension_numbers = #tpu.dot_dimension_numbers<[1], [0], [0], [1], [0, 0, 1, 1], [], []>} : vector<8x128xbf16>, vector<128x128xbf16>, vector<8x128xf32> -> vector<8x128xf32>
    %c0_9 = arith.constant 0 : index
    %c0_10 = arith.constant 0 : index
    %11 = vector.load %arg5[%c0_9, %c0_10] : memref<1x128xf32, #tpu.memory_space<vmem>>, vector<1x128xf32>
    %12 = vector.broadcast %11 : vector<1x128xf32> to vector<8x128xf32>
    %13 = arith.addf %10, %12 : vector<8x128xf32>
    %cst_11 = arith.constant 0.000000e+00 : f32
    %14 = vector.broadcast %cst_11 : f32 to vector<8x128xf32>
    %15 = arith.maximumf %13, %14 : vector<8x128xf32>
    %16 = arith.truncf %15 : vector<8x128xf32> to vector<8x128xbf16>
    %c0_12 = arith.constant 0 : index
    %c0_13 = arith.constant 0 : index
    %17 = vector.load %arg6[%c0_12, %c0_13] : memref<128x128xbf16, #tpu.memory_space<vmem>>, vector<128x128xbf16>
    %cst_14 = arith.constant dense<0.000000e+00> : vector<8x128xf32>
    %18 = tpu.matmul %16, %17, %cst_14 {dimension_numbers = #tpu.dot_dimension_numbers<[1], [0], [0], [1], [0, 0, 1, 1], [], []>} : vector<8x128xbf16>, vector<128x128xbf16>, vector<8x128xf32> -> vector<8x128xf32>
    %c0_15 = arith.constant 0 : index
    %c0_16 = arith.constant 0 : index
    %19 = vector.load %arg7[%c0_15, %c0_16] : memref<1x128xf32, #tpu.memory_space<vmem>>, vector<1x128xf32>
    %20 = vector.broadcast %19 : vector<1x128xf32> to vector<8x128xf32>
    %21 = arith.addf %18, %20 : vector<8x128xf32>
    %22 = tpu.iota {dimensions = array<i32: 1>} : vector<8x128xi32>
    %c10_i32 = arith.constant 10 : i32
    %23 = vector.broadcast %c10_i32 : i32 to vector<8x128xi32>
    %24 = arith.cmpi slt, %22, %23 : vector<8x128xi32>
    %cst_17 = arith.constant 0xFF800000 : f32
    %25 = vector.broadcast %cst_17 : f32 to vector<8x128xf32>
    %26 = arith.select %24, %21, %25 : vector<8x128xi1>, vector<8x128xf32>
    %cst_18 = arith.constant dense<0xFF800000> : vector<8xf32>
    %27 = vector.multi_reduction <maximumf>, %26, %cst_18 [1] : vector<8x128xf32> to vector<8xf32>
    %28 = vector.shape_cast %27 : vector<8xf32> to vector<8x1xf32>
    %29 = vector.broadcast %28 : vector<8x1xf32> to vector<8x128xf32>
    %30 = arith.subf %26, %29 : vector<8x128xf32>
    %31 = math.exp %30 : vector<8x128xf32>
    %cst_19 = arith.constant dense<0.000000e+00> : vector<8xf32>
    %32 = vector.multi_reduction <add>, %31, %cst_19 [1] : vector<8x128xf32> to vector<8xf32>
    %33 = vector.shape_cast %32 : vector<8xf32> to vector<8x1xf32>
    %34 = math.log %33 : vector<8x1xf32>
    %35 = vector.broadcast %34 : vector<8x1xf32> to vector<8x128xf32>
    %36 = arith.subf %30, %35 : vector<8x128xf32>
    %c0_20 = arith.constant 0 : index
    %c0_21 = arith.constant 0 : index
    %37 = vector.load %arg8[%c0_20, %c0_21] : memref<8x128xf32, #tpu.memory_space<vmem>>, vector<8x128xf32>
    tpu.vector_store %arg8[%c0_20, %c0_21], %36 {strides = array<i32>} : memref<8x128xf32, #tpu.memory_space<vmem>>, vector<8x128xf32>,
    return
  }
  func.func @transform_0(%arg0: i32) -> (i32, i32) {
    %c0_i32 = arith.constant 0 : i32
    %c0_i32_0 = arith.constant 0 : i32
    return %arg0, %c0_i32 : i32, i32
  }
  func.func @transform_1(%arg0: i32) -> (i32, i32) {
    %c0_i32 = arith.constant 0 : i32
    %c0_i32_0 = arith.constant 0 : i32
    %c0_i32_1 = arith.constant 0 : i32
    return %c0_i32, %c0_i32_0 : i32, i32
  }
  func.func @transform_2(%arg0: i32) -> (i32, i32) {
    %c0_i32 = arith.constant 0 : i32
    %c0_i32_0 = arith.constant 0 : i32
    %c0_i32_1 = arith.constant 0 : i32
    return %c0_i32, %c0_i32_0 : i32, i32
  }
  func.func @transform_3(%arg0: i32) -> (i32, i32) {
    %c0_i32 = arith.constant 0 : i32
    %c0_i32_0 = arith.constant 0 : i32
    %c0_i32_1 = arith.constant 0 : i32
    return %c0_i32, %c0_i32_0 : i32, i32
  }
  func.func @transform_4(%arg0: i32) -> (i32, i32) {
    %c0_i32 = arith.constant 0 : i32
    %c0_i32_0 = arith.constant 0 : i32
    %c0_i32_1 = arith.constant 0 : i32
    return %c0_i32, %c0_i32_0 : i32, i32
  }
  func.func @transform_5(%arg0: i32) -> (i32, i32) {
    %c0_i32 = arith.constant 0 : i32
    %c0_i32_0 = arith.constant 0 : i32
    %c0_i32_1 = arith.constant 0 : i32
    return %c0_i32, %c0_i32_0 : i32, i32
  }
  func.func @transform_6(%arg0: i32) -> (i32, i32) {
    %c0_i32 = arith.constant 0 : i32
    %c0_i32_0 = arith.constant 0 : i32
    %c0_i32_1 = arith.constant 0 : i32
    return %c0_i32, %c0_i32_0 : i32, i32
  }
  func.func @transform_7(%arg0: i32) -> (i32, i32) {
    %c0_i32 = arith.constant 0 : i32
    %c0_i32_0 = arith.constant 0 : i32
    return %arg0, %c0_i32 : i32, i32
  }
}

</mosaic_0001>

<bundles_post_ra>
// kernel: net_forward.1
= control target key start
LH: loop header
LB: loop body
LE: loop exit
PB: predicated region body
PF: predicated region fallthrough
CT: control target
= control target key end

     0   :  { %v1272_v42 = vmov 0.0   ;;  %vm1273_vm0 = vmmov 0   ;;  %s1594_s0 = inlined_call_operand.vmem [shape: bf16[8,896], index: 0, kind: input, shape index: {}]   ;;  %s1595_s1 = inlined_call_operand.vmem [shape: bf16[896,128], index: 1, kind: input, shape index: {}]   ;;  %s1596_s2 = inlined_call_operand.vmem [shape: f32[1,128], index: 2, kind: input, shape index: {}]   ;;  %s1597_s3 = inlined_call_operand.vmem [shape: bf16[128,128], index: 3, kind: input, shape index: {}]   ;;  %s1598_s4 = inlined_call_operand.vmem [shape: f32[1,128], index: 4, kind: input, shape index: {}]   ;;  %s1599_s5 = inlined_call_operand.vmem [shape: bf16[128,128], index: 5, kind: input, shape index: {}]   ;;  %s1600_s6 = inlined_call_operand.vmem [shape: f32[1,128], index: 6, kind: input, shape index: {}]   ;;  %s1601_s7 = inlined_call_operand.hbm [shape: f32[8,128], index: 7, kind: output, shape index: {}]  }
   0x1   :  { %v1165_v0 = vld [vmem:[%s1595_s1 + $0x40] sm:$0xff]   ;;  %v1169_v4 = vld [vmem:[%s1595_s1 + $0x48] sm:$0xff]   ;;  %v1173_v8 = vld [vmem:[%s1595_s1 + $0x50] sm:$0xff]  }
   0x2   :  { %v1166_v1 = vld [vmem:[%s1595_s1] sm:$0xff]   ;;  %1009 = vmatprep.subr.bf16.mxu0 %v1165_v0  ;;  %v1170_v5 = vld [vmem:[%s1595_s1 + $0x8] sm:$0xff]   ;;  %v1174_v9 = vld [vmem:[%s1595_s1 + $0x10] sm:$0xff]  }
   0x3   :  { %v1167_v2 = vld [vmem:[%s1595_s1 + $0xc0] sm:$0xff]   ;;  %1010 = vmatpush3.bf16.msra.mxu0 %v1166_v1  ;;  %v1171_v6 = vld [vmem:[%s1595_s1 + $0xc8] sm:$0xff]   ;;  %v1175_v10 = vld [vmem:[%s1595_s1 + $0xd0] sm:$0xff]  }
   0x4   :  { %v1168_v3 = vld [vmem:[%s1595_s1 + $0x80] sm:$0xff]   ;;  %1031 = vmatprep.subr.bf16.mxu1 %v1167_v2  ;;  %1011 = vmatprep.subr.bf16.mxu0 %v1169_v4  ;;  %v1172_v7 = vld [vmem:[%s1595_s1 + $0x88] sm:$0xff]   ;;  %v1176_v11 = vld [vmem:[%s1595_s1 + $0x90] sm:$0xff]  }
   0x5   :  { %1032 = vmatpush3.bf16.msra.mxu1 %v1168_v3  ;;  %v1177_v12 = vld [vmem:[%s1595_s1 + $0x58] sm:$0xff]   ;;  %v1181_v16 = vld [vmem:[%s1595_s1 + $0x60] sm:$0xff]   ;;  %v1185_v20 = vld [vmem:[%s1595_s1 + $0x68] sm:$0xff]  }
   0x6   :  { %1033 = vmatprep.subr.bf16.mxu1 %v1171_v6  ;;  %v1178_v13 = vld [vmem:[%s1595_s1 + $0x18] sm:$0xff]   ;;  %v1182_v17 = vld [vmem:[%s1595_s1 + $0x20] sm:$0xff]   ;;  %v1186_v21 = vld [vmem:[%s1595_s1 + $0x28] sm:$0xff]  }
   0x7   :  { %1012 = vmatpush3.bf16.msra.mxu0 %v1170_v5  ;;  %v1179_v14 = vld [vmem:[%s1595_s1 + $0xd8] sm:$0xff]   ;;  %v1183_v18 = vld [vmem:[%s1595_s1 + $0xe0] sm:$0xff]   ;;  %v1187_v22 = vld [vmem:[%s1595_s1 + $0xe8] sm:$0xff]  }
   0x8   :  { %1013 = vmatprep.subr.bf16.mxu0 %v1173_v8  ;;  %v1180_v15 = vld [vmem:[%s1595_s1 + $0x98] sm:$0xff]   ;;  %v1184_v19 = vld [vmem:[%s1595_s1 + $0xa0] sm:$0xff]   ;;  %v1188_v23 = vld [vmem:[%s1595_s1 + $0xa8] sm:$0xff]  }
   0x9   :  { %1034 = vmatpush3.bf16.msra.mxu1 %v1172_v7  ;;  %v1189_v24 = vld [vmem:[%s1595_s1 + $0x70] sm:$0xff]   ;;  %v1193_v28 = vld [vmem:[%s1595_s1 + $0x78] sm:$0xff]   ;;  %v28_v31 = vld [vmem:[%s1594_s0] sm:$0xff] }
   0xa   :  { %1035 = vmatprep.subr.bf16.mxu1 %v1175_v10  ;;  %v1190_v25 = vld [vmem:[%s1595_s1 + $0x30] sm:$0xff]   ;;  %v1194_v29 = vld [vmem:[%s1595_s1 + $0x38] sm:$0xff]   ;;  %v928_v32 = vcombine.low %v28_v31, %v28_v31  ;;  %v929_v33 = vcombine.high %v28_v31, %v28_v31  ;;  %v1199_v35 = vld [vmem:[%s1595_s1 + $0x140] sm:$0xff]  }
   0xb   :  { %1014 = vmatpush3.bf16.msra.mxu0 %v1174_v9  ;;  %v1191_v26 = vld [vmem:[%s1595_s1 + $0xf0] sm:$0xff]   ;;  %v1195_v30 = vld [vmem:[%s1595_s1 + $0xf8] sm:$0xff]   ;;  %v29_v36 = vld [vmem:[%s1594_s0 + $0x8] sm:$0xff] }
   0xc   :  { %1015 = vmatprep.subr.bf16.mxu0 %v1177_v12  ;;  %v1192_v27 = vld [vmem:[%s1595_s1 + $0xb0] sm:$0xff]   ;;  %v1198_v34 = vld [vmem:[%s1595_s1 + $0xb8] sm:$0xff]   ;;  %544 = vmatprep.mubr.bf16.mxu0 %v929_v33  ;;  %v930_v37 = vcombine.low %v29_v36, %v29_v36  ;;  %v931_v38 = vcombine.high %v29_v36, %v29_v36  ;;  %v1202_v39 = vld [vmem:[%s1595_s1 + $0x100] sm:$0xff]  }
   0xd   :  { %1036 = vmatpush3.bf16.msra.mxu1 %v1176_v11  ;;  %v1203_v40 = vld [vmem:[%s1595_s1 + $0x180] sm:$0xff]   ;;  %v1204_v41 = vld [vmem:[%s1595_s1 + $0x148] sm:$0xff]   ;;  %v1207_v45 = vld [vmem:[%s1595_s1 + $0x150] sm:$0xff]  }
   0xe   :  { %1037 = vmatprep.subr.bf16.mxu1 %v1179_v14  ;;  %584 = vmatprep.mubr.bf16.mxu1 %v931_v38  ;;  %v1205_v43 = vld [vmem:[%s1595_s1 + $0x108] sm:$0xff]   ;;  %v1208_v46 = vld [vmem:[%s1595_s1 + $0x110] sm:$0xff]   ;;  %v1210_v48 = vld [vmem:[%s1595_s1 + $0x158] sm:$0xff]  }
   0xf   :  { %1016 = vmatpush3.bf16.msra.mxu0 %v1178_v13  ;;  %v1206_v44 = vld [vmem:[%s1595_s1 + $0x188] sm:$0xff]   ;;  %v1209_v47 = vld [vmem:[%s1595_s1 + $0x190] sm:$0xff]   ;;  %v1211_v49 = vld [vmem:[%s1595_s1 + $0x118] sm:$0xff]  }
  0x10   :  { %1017 = vmatprep.subr.bf16.mxu0 %v1181_v16  ;;  %v1213_v50 = vld [vmem:[%s1595_s1 + $0x160] sm:$0xff]   ;;  %v1212_v51 = vld [vmem:[%s1595_s1 + $0x198] sm:$0xff]   ;;  %v1216_v53 = vld [vmem:[%s1595_s1 + $0x168] sm:$0xff]  }
  0x11   :  { %1038 = vmatpush3.bf16.msra.mxu1 %v1180_v15  ;;  %v1214_v52 = vld [vmem:[%s1595_s1 + $0x120] sm:$0xff]   ;;  %v1217_v55 = vld [vmem:[%s1595_s1 + $0x128] sm:$0xff]   ;;  %v1219_v56 = vld [vmem:[%s1595_s1 + $0x170] sm:$0xff]  }
  0x12   :  { %1039 = vmatprep.subr.bf16.mxu1 %v1183_v18  ;;  %v1215_v54 = vld [vmem:[%s1595_s1 + $0x1a0] sm:$0xff]   ;;  %v1218_v57 = vld [vmem:[%s1595_s1 + $0x1a8] sm:$0xff]   ;;  %v1220_v58 = vld [vmem:[%s1595_s1 + $0x130] sm:$0xff]  }
  0x13   :  { %1018 = vmatpush3.bf16.msra.mxu0 %v1182_v17  ;;  %v30_v59 = vld [vmem:[%s1594_s0 + $0x10] sm:$0xff]  ;;  %v1222_v62 = vld [vmem:[%s1595_s1 + $0x178] sm:$0xff]  }
  0x14   :  { %1019 = vmatprep.subr.bf16.mxu0 %v1185_v20  ;;  %v1221_v60 = vld [vmem:[%s1595_s1 + $0x1b0] sm:$0xff]   ;;  %v933_v61 = vcombine.high %v30_v59, %v30_v59  ;;  %v1223_v63 = vld [vmem:[%s1595_s1 + $0x138] sm:$0xff]   ;;  %v932_v1 = vcombine.low %v30_v59, %v30_v59 }
  0x15   :  { %1040 = vmatpush3.bf16.msra.mxu1 %v1184_v19  ;;  %v1226_v0 = vld [vmem:[%s1595_s1 + $0x1b8] sm:$0xff]  }
  0x16   :  { %1041 = vmatprep.subr.bf16.mxu1 %v1187_v22  ;;  %v1227_v2 = vld [vmem:[%s1594_s0 + $0x18] ss:$0 sps:$4 sm:$0xff]  }
  0x17   :  { %1020 = vmatpush3.bf16.msra.mxu0 %v1186_v21 }
  0x18   :  { %1021 = vmatprep.subr.bf16.mxu0 %v1189_v24 }
  0x19   :  { %1042 = vmatpush3.bf16.msra.mxu1 %v1188_v23 }
  0x1a   :  { %1043 = vmatprep.subr.bf16.mxu1 %v1191_v26 }
  0x1b   :  { %1022 = vmatpush3.bf16.msra.mxu0 %v1190_v25 }
  0x1c   :  { %1023 = vmatprep.subr.bf16.mxu0 %v1193_v28 }
  0x1d   :  { %1044 = vmatpush3.bf16.msra.mxu1 %v1192_v27 }
  0x1e   :  { %1045 = vmatprep.subr.bf16.mxu1 %v1195_v30 }
  0x1f   :  { %1024 = vmatpush3.bf16.msra.mxu0 %v1194_v29 }
  0x20   :  { %1053 = vmatprep.subr.bf16.mxu0 %v1199_v35 }
  0x21   :  { %1046 = vmatpush3.bf16.msra.mxu1 %v1198_v34 }
  0x22   :  { %545 = vmatmul.mubr.bf16.vlgmr.msra.gmra.mrb[0].mxu0 %v928_v32  ;;  %1102 = vmatprep.subr.bf16.mxu1 %v1272_v42 }
  0x23   :  { %1054 = vmatpush3.bf16.msra.mxu0 %v1202_v39  ;;  %624 = vmatprep.mubr.bf16.mxu0 %v933_v61 }
  0x24   :  { %585 = vmatmul.mubr.bf16.vlgmr.msra.gmra.mrb[0].mxu1 %v930_v37  ;;  %1055 = vmatprep.subr.bf16.mxu0 %v1204_v41 }
  0x25   :  { %1103 = vmatpush3.bf16.msra.mxu1 %v1203_v40  ;;  %1118 = vmatprep.mubr.msk.bf16.mxu1 %vm1273_vm0, %v1272_v42 }
  0x26   :  { %1104 = vmatprep.subr.bf16.mxu1 %v1272_v42 }
  0x27   :  { %1056 = vmatpush3.bf16.msra.mxu0 %v1205_v43 }
  0x28   :  { %1057 = vmatprep.subr.bf16.mxu0 %v1207_v45 }
  0x29   :  { %1105 = vmatpush3.bf16.msra.mxu1 %v1206_v44 }
  0x2a   :  { %1106 = vmatprep.subr.bf16.mxu1 %v1272_v42 }
  0x2b   :  { %1058 = vmatpush3.bf16.msra.mxu0 %v1208_v46 }
  0x2c   :  { %1059 = vmatprep.subr.bf16.mxu0 %v1210_v48 }
  0x2d   :  { %1107 = vmatpush3.bf16.msra.mxu1 %v1209_v47 }
  0x2e   :  { %1108 = vmatprep.subr.bf16.mxu1 %v1272_v42 }
  0x2f   :  { %1060 = vmatpush3.bf16.msra.mxu0 %v1211_v49 }
  0x30   :  { %1061 = vmatprep.subr.bf16.mxu0 %v1213_v50 }
  0x31   :  { %1109 = vmatpush3.bf16.msra.mxu1 %v1212_v51 }
  0x32   :  { %1110 = vmatprep.subr.bf16.mxu1 %v1272_v42 }
  0x33   :  { %1062 = vmatpush3.bf16.msra.mxu0 %v1214_v52 }
  0x34   :  { %1063 = vmatprep.subr.bf16.mxu0 %v1216_v53 }
  0x35   :  { %1111 = vmatpush3.bf16.msra.mxu1 %v1215_v54 }
  0x36   :  { %1112 = vmatprep.subr.bf16.mxu1 %v1272_v42 }
  0x37   :  { %1064 = vmatpush3.bf16.msra.mxu0 %v1217_v55 }
  0x38   :  { %1065 = vmatprep.subr.bf16.mxu0 %v1219_v56 }
  0x39   :  { %1113 = vmatpush3.bf16.msra.mxu1 %v1218_v57 }
  0x3a   :  { %1114 = vmatprep.subr.bf16.mxu1 %v1272_v42 }
  0x3b   :  { %1066 = vmatpush3.bf16.msra.mxu0 %v1220_v58 }
  0x3c   :  { %1067 = vmatprep.subr.bf16.mxu0 %v1222_v62 }
  0x3d   :  { %1115 = vmatpush3.bf16.msra.mxu1 %v1221_v60 }
  0x3e   :  { %1116 = vmatprep.subr.bf16.mxu1 %v1272_v42 }
  0x3f   :  { %1068 = vmatpush3.bf16.msra.mxu0 %v1223_v63 }
  0x40   :  { %1122 = vmatprep.subr.bf16.mxu0 %v1272_v42 }
  0x41   :  { %1117 = vmatpush3.bf16.msra.mxu1 %v1226_v0 }
  0x42   :  { %625 = vmatmul.mubr.bf16.vlgmr.msra.gmra.mrb[4].mxu0 %v932_v1  ;;  %1142 = vmatprep.subr.bf16.mxu1 %v1272_v42 }
  0x43   :  { %1138 = vmatprep.mubr.msk.bf16.mxu0 %vm1273_vm0, %v1272_v42 }
  0x44   :  { %12 = vsyncpa [#allocation3], 0  ;;  %1119 = vmatmul.mubr.bf16.vlgmr.msra.gmra.mrb[4].mxu1 %v1227_v2  ;;  %v1228_v3 = vld [vmem:[%s1597_s3] sm:$0xff]   ;;  %v1229_v4 = vld [vmem:[%s1597_s3 + $0x8] sm:$0xff]   ;;  %v898_v54 = vlaneseq }
  0x45   :  { %1158 = vmatprep.mubr.msk.bf16.mxu1 %vm1273_vm0, %v1272_v42  ;;  %1123 = vmatpush3.bf16.msra.mxu0 %v1228_v3  ;;  %v1230_v5 = vld [vmem:[%s1597_s3 + $0x10] sm:$0xff]   ;;  %v1231_v6 = vld [vmem:[%s1597_s3 + $0x18] sm:$0xff]   ;;  %v1232_v7 = vld [vmem:[%s1597_s3 + $0x20] sm:$0xff]  }
  0x46   :  { %1124 = vmatprep.subr.bf16.mxu0 %v1272_v42  ;;  %v1233_v8 = vld [vmem:[%s1597_s3 + $0x28] sm:$0xff]   ;;  %v1234_v9 = vld [vmem:[%s1597_s3 + $0x30] sm:$0xff]   ;;  %v1235_v10 = vld [vmem:[%s1597_s3 + $0x38] sm:$0xff]   ;;  %v899_v55 = vand.u32 127, %v898_v54 }
  0x47   :  { %v1236_v11 = vld [vmem:[%s1599_s5] sm:$0xff]   ;;  %v1237_v12 = vld [vmem:[%s1599_s5 + $0x8] sm:$0xff]   ;;  %v1238_v13 = vld [vmem:[%s1599_s5 + $0x10] sm:$0xff]  }
  0x48   :  { %1143 = vmatpush3.bf16.msra.mxu1 %v1236_v11  ;;  %v1239_v14 = vld [vmem:[%s1599_s5 + $0x18] sm:$0xff]   ;;  %v1240_v15 = vld [vmem:[%s1599_s5 + $0x20] sm:$0xff]   ;;  %v1241_v16 = vld [vmem:[%s1599_s5 + $0x28] sm:$0xff]   ;;  %vm900_vm1 = vcmp.lt.s32.totalorder %v899_v55, 10 }
  0x49   :  { %1125 = vmatpush3.bf16.msra.mxu0 %v1229_v4  ;;  %1144 = vmatprep.subr.bf16.mxu1 %v1272_v42  ;;  %v927_v18 = vld [vmem:[%s1596_s2] ss:$0 sm:$0xff]  ;;  %v1242_v44 = vld [vmem:[%s1599_s5 + $0x30] sm:$0xff]   ;;  %v1243_v45 = vld [vmem:[%s1599_s5 + $0x38] sm:$0xff]  }
  0x4a   :  { %1126 = vmatprep.subr.bf16.mxu0 %v1272_v42  ;;  %v991_v46 = vld [vmem:[%s1598_s4] ss:$0 sm:$0xff]  ;;  %s1274_s4 = smov [#allocation2]  }
  0x4b   :  { %s919_s5 = sshll.u32 %s1274_s4, 4  ;;  %s920_s5 = int_to_ptr.vmem [resolvable:$true] %s919_s5 }
  0x4c   :  { %1145 = vmatpush3.bf16.msra.mxu1 %v1237_v12  ;;  %p1253_p1 = scmp.lt.s32.totalorder %s920_s5, %s920_s5 }
  0x4d   :  { %1127 = vmatpush3.bf16.msra.mxu0 %v1230_v5  ;;  %1146 = vmatprep.subr.bf16.mxu1 %v1272_v42 }
  0x4e   :  { %1128 = vmatprep.subr.bf16.mxu0 %v1272_v42 }
  0x50   :  { %1147 = vmatpush3.bf16.msra.mxu1 %v1238_v13 }
  0x51   :  { %1129 = vmatpush3.bf16.msra.mxu0 %v1231_v6  ;;  %1148 = vmatprep.subr.bf16.mxu1 %v1272_v42 }
  0x52   :  { %1130 = vmatprep.subr.bf16.mxu0 %v1272_v42 }
  0x54   :  { %1149 = vmatpush3.bf16.msra.mxu1 %v1239_v14 }
  0x55   :  { %1131 = vmatpush3.bf16.msra.mxu0 %v1232_v7  ;;  %1150 = vmatprep.subr.bf16.mxu1 %v1272_v42 }
  0x56   :  { %1132 = vmatprep.subr.bf16.mxu0 %v1272_v42 }
  0x58   :  { %1151 = vmatpush3.bf16.msra.mxu1 %v1240_v15 }
  0x59   :  { %1133 = vmatpush3.bf16.msra.mxu0 %v1233_v8  ;;  %1152 = vmatprep.subr.bf16.mxu1 %v1272_v42 }
  0x5a   :  { %1134 = vmatprep.subr.bf16.mxu0 %v1272_v42 }
  0x5c   :  { %1153 = vmatpush3.bf16.msra.mxu1 %v1241_v16 }
  0x5d   :  { %1135 = vmatpush3.bf16.msra.mxu0 %v1234_v9  ;;  %1154 = vmatprep.subr.bf16.mxu1 %v1272_v42 }
  0x5e   :  { %1136 = vmatprep.subr.bf16.mxu0 %v1272_v42 }
  0x60   :  { %1155 = vmatpush3.bf16.msra.mxu1 %v1242_v44 }
  0x61   :  { %1137 = vmatpush3.bf16.msra.mxu0 %v1235_v10  ;;  %1156 = vmatprep.subr.bf16.mxu1 %v1272_v42  ;;  %v1000_v42 = vld [vmem:[%s1600_s6] ss:$0 sm:$0xff]  ;;  %s1248_s6 = scalar_lea.vmem %s920_s5, 128 }
  0x62   :  { %p1249_p0 = scmp.ne.s32.totalorder %s920_s5, %s1248_s6  ;;  %p1254_p2 = scmp.lt.s32.totalorder %s1248_s6, %s1248_s6 }
  0x64   :  { %1157 = vmatpush3.bf16.msra.mxu1 %v1243_v45  ;;  %p1255_p3 = por %p1254_p2, %p1253_p1 }
  0x66   :  { %p1256_p4 = pnand %p1255_p3, %p1249_p0 }
  0xf5   :  { %v1025_v17 = vpop.f32.mrb[0].mxu0 }
  0xf6   :  { %v1026_v19 = vpop.f32.mrb[1].mxu0 }
  0xf7   :  { %v1027_v20 = vadd.f32 %v1026_v19, %v1025_v17  ;;  %v1028_v21 = vpop.f32.mrb[2].mxu0  ;;  %v1047_v22 = vpop.f32.mrb[0].mxu1 }
  0xf8   :  { %v1029_v23 = vpop.f32.mrb[3].mxu0  ;;  %v1048_v24 = vpop.f32.mrb[1].mxu1 }
  0xf9   :  { %v547_v25 = vadd.f32 %v1027_v20, %v927_v18  ;;  %v1049_v26 = vadd.f32 %v1048_v24, %v1047_v22  ;;  %v1050_v27 = vpop.f32.mrb[2].mxu1 }
  0xfa   :  { %v1051_v28 = vpop.f32.mrb[3].mxu1 }
  0xfb   :  { %v587_v29 = vadd.f32 %v1049_v26, %v547_v25 }
 0x115   :  { %v1069_v30 = vpop.f32.mrb[4].mxu0 }
 0x116   :  { %v1070_v31 = vpop.f32.mrb[5].mxu0 }
 0x117   :  { %v1071_v32 = vadd.f32 %v1070_v31, %v1069_v30  ;;  %v1072_v33 = vpop.f32.mrb[6].mxu0  ;;  %v666_v34 = vpop.f32.mrb[4].mxu1 }
 0x118   :  { %v1073_v35 = vpop.f32.mrb[7].mxu0  ;;  %v1120_v36 = vpop.f32.mrb[5].mxu1 }
 0x119   :  { %v627_v37 = vadd.f32 %v1071_v32, %v587_v29  ;;  %v669_v38 = vpop.f32.mrb[6].mxu1 }
 0x11a   :  { %v1121_v39 = vpop.f32.mrb[7].mxu1 }
 0x11b   :  { %v667_v40 = vadd.f32 %v666_v34, %v627_v37 }
 0x11d   :  { %v672_v41 = vmax.f32 %v667_v40, 0.0 }
 0x11f   :  { %v673_v43 = vpack.c.bf16 %v672_v41, %v672_v41 }
 0x121   :  { %1139 = vmatmul.mubr.bf16.vlgmr.msra.gmra.mrb[8].mxu0 %v673_v43 }
 0x1f4   :  { %v779_v47 = vpop.f32.mrb[8].mxu0 }
 0x1f5   :  { %v780_v48 = vadd.f32 %v991_v46, %v779_v47  ;;  %v1140_v49 = vpop.f32.mrb[9].mxu0 }
 0x1f6   :  { %v782_v50 = vpop.f32.mrb[10].mxu0 }
 0x1f7   :  { %v785_v51 = vmax.f32 %v780_v48, 0.0  ;;  %v1141_v52 = vpop.f32.mrb[11].mxu0 }
 0x1f9   :  { %v786_v53 = vpack.c.bf16 %v785_v51, %v785_v51 }
 0x1fb   :  { %1159 = vmatmul.mubr.bf16.vlgmr.msra.gmra.mrb[8].mxu1 %v786_v53 }
 0x2ce   :  { %v892_v56 = vpop.f32.mrb[8].mxu1 }
 0x2cf   :  { %v893_v57 = vadd.f32 %v1000_v42, %v892_v56  ;;  %v1160_v58 = vpop.f32.mrb[9].mxu1 }
 0x2d0   :  { %v895_v59 = vpop.f32.mrb[10].mxu1 }
 0x2d1   :  { %v1161_v60 = vpop.f32.mrb[11].mxu1  ;;  %v901_v61 = vsel %vm900_vm1, %v893_v57, -inf }
 0x2d2   :  { %902 = vmax.xlane.f32.xlu0 %v901_v61 }
 0x35f   :  { %v903_v62 = vpop.xlane.xlu0 %902 }
 0x360   :  { %v904_v63 = vsub.f32 %v901_v61, %v903_v62 }
 0x362   :  { %v905_v0 = vmul.f32 1.442695, %v904_v63 }
 0x364   :  { %1244 = vpow2.f32 %v905_v0 }
 0x36e   :  { %v1245_v1 = vpop.eup %1244 }
 0x36f   :  { %907 = vadd.xlane.f32.xlu0 %v1245_v1 }
 0x3fc   :  { %v908_v2 = vpop.xlane.xlu0 %907 }
 0x3fd   :  { %1246 = vlog2.f32 %v908_v2 }
 0x407   :  { %v1247_v3 = vpop.eup %1246 }
 0x408   :  { %v910_v4 = vmul.f32 0.6931472, %v1247_v3 }
 0x40a   :  { %v911_v5 = vsub.f32 %v904_v63, %v910_v4 }
 0x40c   :  { %912 = vst [vmem:[#allocation2] sm:$0xff] %v911_v5 }
 0x40d   :  { %1259 = shalt.err (!%p1256_p4)
}
 0x40e   :  { %s1260_s17 = scalar_lea.hbm %s1601_s7, 128 }
 0x40f   :  { %p1261_p5 = scmp.ne.s32.totalorder %s1601_s7, %s1260_s17  ;;  %p1264_p6 = scmp.lt.u32.totalorder %s1260_s17, %s1601_s7 }
 0x411   :  { %p1266_p7 = pnand %p1264_p6, %p1261_p5 }
 0x413   :  { %1269 = shalt.err (!%p1266_p7)
}
 0x414   :  { %922 = dma.vmem_to_hbm [thread:$0]  %s920_s5, 128, %s1601_s7, [#allocation3]  }
 0x415   :  { %1270 = dma.done.wait [#allocation3], 128  }
 0x416   :  { %1271 = vsyncadd [#allocation3], 4294967168 }
 0x417   :  { %926 = vsyncpa [#allocation3], 1 }

</bundles_post_ra>
